<compile_context>
chip_gen: v7x
topology: tpu7x:2x2x1
jax: 0.10.0
libtpu: 0.0.40
codegen_flags: <defaults>
</compile_context>

<pallas_src>
import jax
import jax.numpy as jnp
from jax.experimental import pallas as pl
from jax.experimental.pallas import tpu as pltpu


L_SPATIAL = 4      # fc1 expects 16 * 4 input features -> conv input length 4
OUT_PAD = 128      # lane-dense padded width of the final output block


def _round_up(x, m):
    return (x + m - 1) // m * m


def net_kernel(x_ref, w1_ref, b1_ref, w2_ref, b2_ref,
               wf1_ref, bf1_ref, wf2_ref, bf2_ref, wf3_ref, bf3_ref,
               out_ref):
    bf16 = jnp.bfloat16
    x = x_ref[...]                                                 # (TB, 24) f32
    # conv1 (k=1) + ReLU: pure VPU elementwise against broadcast weights
    # (input already expanded m-major to 24 lanes by the wrapper).
    h1 = jnp.maximum(x * w1_ref[...] + b1_ref[...], 0.0)          # (TB, 24) f32
    # MaxPool1d(kernel_size=1, stride=1) is the identity -> no-op.
    # conv2 (k=1) + ReLU as a block-diagonal matmul; bf16 MXU inputs,
    # f32 accumulate, f32 bias/ReLU on the VPU.
    h2 = jnp.maximum(
        jnp.dot(h1.astype(bf16), w2_ref[...],
                preferred_element_type=jnp.float32)
        + b2_ref[...], 0.0)                                        # (TB, 64) f32
    # fc1 + ReLU (flatten's channel-major order folded into wf1's rows,
    # output zero-padded to a full 128-lane vreg).
    f1 = jnp.maximum(
        jnp.dot(h2.astype(bf16), wf1_ref[...],
                preferred_element_type=jnp.float32)
        + bf1_ref[...], 0.0)                                       # (TB, 128) f32
    # fc2 + ReLU
    f2 = jnp.maximum(
        jnp.dot(f1.astype(bf16), wf2_ref[...],
                preferred_element_type=jnp.float32)
        + bf2_ref[...], 0.0)                                       # (TB, 32) f32
    # fc3 (padded to 128 lanes -> lane-dense store), bf16 writeback.
    out = (jnp.dot(f2.astype(bf16), wf3_ref[...],
                   preferred_element_type=jnp.float32)
           + bf3_ref[...])                                         # (TB, 128) f32
    out_ref[...] = out.astype(out_ref.dtype)


def _prep_weights(params):
    """One-time (trace-time) reshaping of torch-layout params into kernel form."""
    w1, b1, w2, b2, wf1, bf1, wf2, bf2, wf3, bf3 = params
    L = L_SPATIAL
    C1 = w1.shape[1]          # 6
    C2 = w2.shape[1]          # 16
    H1 = wf1.shape[1]         # 120
    NO = wf3.shape[1]         # 3
    bf16 = jnp.bfloat16

    # conv1 as a broadcast VPU weight over the m-major expanded input:
    # expanded column m*C1 + d  ->  weight w1[0, d], bias b1[0, d].
    w1row = jnp.tile(w1, (1, L))                                  # (1, L*C1)
    b1row = jnp.tile(b1, (1, L))                                  # (1, L*C1)
    # conv2: W2b[m*C1 + d, l*C2 + e] = (m == l) * w2[d, e]  (block diagonal).
    eye_l = jnp.eye(L, dtype=jnp.float32)
    w2b = (eye_l[:, None, :, None] * w2[None, :, None, :]).reshape(L * C1, L * C2)
    b2e = jnp.tile(b2, (1, L))                                    # (1, L*C2)
    # fc1: torch.flatten on NCL is channel-major (row c*L + l); the kernel's
    # h2 column order is l*C2 + c -> permute wf1's rows once here.  Also pad
    # the 120-wide output to 128 lanes (zero pad, exact math).
    wf1_perm = wf1.reshape(C2, L, H1).transpose(1, 0, 2).reshape(L * C2, H1)
    wf1_p = jnp.pad(wf1_perm, ((0, 0), (0, 128 - H1)))            # (64, 128)
    bf1_p = jnp.pad(bf1, ((0, 0), (0, 128 - H1)))                 # (1, 128)
    wf2_p = jnp.pad(wf2, ((0, 128 - H1), (0, 0)))                 # (128, 32)
    # fc3: pad the 3-wide output to a full 128-lane vreg (lane-dense store).
    wf3_p = jnp.pad(wf3, ((0, 0), (0, OUT_PAD - NO)))             # (32, 128)
    bf3_p = jnp.pad(bf3, ((0, 0), (0, OUT_PAD - NO)))             # (1, 128)

    # Matmul RHS weights in bf16 (native MXU path); biases and the VPU-only
    # conv1 weight stay f32 so bias-add/ReLU remain f32 on every generation.
    return (w1row, b1row,
            w2b.astype(bf16), b2e,
            wf1_p.astype(bf16), bf1_p,
            wf2_p.astype(bf16), bf2,
            wf3_p.astype(bf16), bf3_p)


def net_forward(x_ncl, params, *, block_b=2048):
    """x_ncl: (B, 1, 4) float32 in PyTorch NCL layout.  Returns (B, 3) f32."""
    B, C_in, L = x_ncl.shape
    assert C_in == 1 and L == L_SPATIAL
    C1 = params[0].shape[1]                                       # 6

    # C_in == 1 -> NCL to (B, L) is just a reshape (no transpose copy).
    x2d = x_ncl.reshape(B, L).astype(jnp.float32)
    # Expand positions 4 -> 24 (m-major: column m*C1+d = x[:, m]) so conv1 is
    # a pure VPU multiply in the kernel instead of a degenerate K=4 MXU pass.
    x_exp = jnp.repeat(x2d, C1, axis=1)                           # (B, L*C1)
    n_feat = x_exp.shape[1]

    weights = _prep_weights(params)

    # Batch tiling:
    #  - at least 2 tiles so v7x's two TensorCores both get work,
    #  - at least ceil(B/block_b) tiles so per-tile footprint stays bounded,
    #  - tile size rounded to 16 sublanes (bf16 output packing) and chosen so
    #    tiles divide the padded batch evenly (minimal zero-padded rows).
    num_tiles = max(2, pl.cdiv(B, block_b))
    tb = max(16, _round_up(pl.cdiv(B, num_tiles), 16))
    b_pad = tb * pl.cdiv(B, tb)
    if b_pad != B:
        x_exp = jnp.pad(x_exp, ((0, b_pad - B), (0, 0)))

    def resident(w):
        # Full-shape block with constant index -> fetched once, stays in VMEM.
        return pl.BlockSpec(w.shape, lambda i: (0, 0))

    out_padded = pl.pallas_call(
        net_kernel,
        out_shape=jax.ShapeDtypeStruct((b_pad, OUT_PAD), jnp.bfloat16),
        grid_spec=pltpu.PrefetchScalarGridSpec(
            num_scalar_prefetch=0,
            grid=(b_pad // tb,),
            in_specs=[pl.BlockSpec((tb, n_feat), lambda i: (i, 0))]
                     + [resident(w) for w in weights],
            out_specs=pl.BlockSpec((tb, OUT_PAD), lambda i: (i, 0)),
        ),
        compiler_params=pltpu.CompilerParams(
            dimension_semantics=("parallel",)),
    )(x_exp, *weights)

    return out_padded[:B, :3].astype(jnp.float32)


def net_reference(x_ncl, params):
    """Pure-JAX f32 reference mirroring the PyTorch forward exactly."""
    w1, b1, w2, b2, wf1, bf1, wf2, bf2, wf3, bf3 = params
    B = x_ncl.shape[0]
    x = jnp.transpose(x_ncl, (0, 2, 1))                           # (B, L, 1)
    h1 = jnp.maximum(jnp.einsum('blc,cd->bld', x, w1) + b1, 0.0)
    h2 = jnp.maximum(jnp.einsum('bld,de->ble', h1, w2) + b2, 0.0)
    flat = jnp.transpose(h2, (0, 2, 1)).reshape(B, -1)            # torch.flatten (NCL)
    f1 = jnp.maximum(flat @ wf1 + bf1, 0.0)
    f2 = jnp.maximum(f1 @ wf2 + bf2, 0.0)
    return f2 @ wf3 + bf3


def init_params(key):
    """Deterministic synthetic parameters with the module's shapes.

    Conv weights are stored as (C_in, C_out) (torch Conv1d weight (C_out,C_in,1)
    transposed, kernel dim squeezed).  FC weights are stored as (in, out)
    (torch Linear weight transposed).  Biases are kept 2D for TPU layout.
    """
    ks = jax.random.split(key, 10)
    scale = 0.1
    w1 = scale * jax.random.normal(ks[0], (1, 6), jnp.float32)       # conv1
    b1 = scale * jax.random.normal(ks[1], (1, 6), jnp.float32)
    w2 = scale * jax.random.normal(ks[2], (6, 16), jnp.float32)      # conv2
    b2 = scale * jax.random.normal(ks[3], (1, 16), jnp.float32)
    wf1 = scale * jax.random.normal(ks[4], (64, 120), jnp.float32)   # fc1
    bf1 = scale * jax.random.normal(ks[5], (1, 120), jnp.float32)
    wf2 = scale * jax.random.normal(ks[6], (120, 32), jnp.float32)   # fc2
    bf2 = scale * jax.random.normal(ks[7], (1, 32), jnp.float32)
    wf3 = scale * jax.random.normal(ks[8], (32, 3), jnp.float32)     # fc3
    bf3 = scale * jax.random.normal(ks[9], (1, 3), jnp.float32)
    return (w1, b1, w2, b2, wf1, bf1, wf2, bf2, wf3, bf3)


if __name__ == "__main__":
    key = jax.random.PRNGKey(0)
    pkey, xkey1, xkey2 = jax.random.split(key, 3)
    params = init_params(pkey)

    # fc1 expects 16*4 features, so the conv input length must be 4.
    B, C_in, L = 2, 1, L_SPATIAL
    x = jax.random.normal(xkey1, (B, C_in, L), jnp.float32)     # PyTorch NCL input

    out = jax.block_until_ready(net_forward(x, params))
    assert out.shape == (B, 3), out.shape
    ref = jax.block_until_ready(net_reference(x, params))
    err = float(jnp.max(jnp.abs(out - ref)))
    # bf16 MXU inputs + bf16 writeback (f32 accumulate): tolerance 5e-3.
    assert err < 5e-3, f"max abs err vs reference (B=2): {err}"

    # Exercise the multi-tile path (grid > 1, padded batch rows discarded).
    B2 = 40
    x2 = jax.random.normal(xkey2, (B2, C_in, L), jnp.float32)
    out2 = jax.block_until_ready(net_forward(x2, params))
    assert out2.shape == (B2, 3), out2.shape
    ref2 = jax.block_until_ready(net_reference(x2, params))
    err2 = float(jnp.max(jnp.abs(out2 - ref2)))
    assert err2 < 5e-3, f"max abs err vs reference (B=40): {err2}"

    print("KERNEL_OK")
</pallas_src>

<mosaic_0001>
module attributes {stable_mosaic.version = 11 : i64} {
  func.func @net_kernel(%arg0: i32, %arg1: memref<16x24xf32, #tpu.memory_space<vmem>>, %arg2: memref<1x24xf32, #tpu.memory_space<vmem>>, %arg3: memref<1x24xf32, #tpu.memory_space<vmem>>, %arg4: memref<24x64xbf16, #tpu.memory_space<vmem>>, %arg5: memref<1x64xf32, #tpu.memory_space<vmem>>, %arg6: memref<64x128xbf16, #tpu.memory_space<vmem>>, %arg7: memref<1x128xf32, #tpu.memory_space<vmem>>, %arg8: memref<128x32xbf16, #tpu.memory_space<vmem>>, %arg9: memref<1x32xf32, #tpu.memory_space<vmem>>, %arg10: memref<32x128xbf16, #tpu.memory_space<vmem>>, %arg11: memref<1x128xf32, #tpu.memory_space<vmem>>, %arg12: memref<16x128xbf16, #tpu.memory_space<vmem>>) attributes {dimension_semantics = [#tpu.dimension_semantics<parallel>], iteration_bounds = array<i64: 1>, scalar_prefetch = 0 : i64, scratch_operands = 0 : i64, tpu.core_type = #tpu.core_type<tc>, window_params = [{transform_indices = @transform_0, window_bounds = array<i64: 16, 24>}, {pipeline_mode = #tpu.pipeline_mode<synchronous>, transform_indices = @transform_1, window_bounds = array<i64: 1, 24>}, {pipeline_mode = #tpu.pipeline_mode<synchronous>, transform_indices = @transform_2, window_bounds = array<i64: 1, 24>}, {pipeline_mode = #tpu.pipeline_mode<synchronous>, transform_indices = @transform_3, window_bounds = array<i64: 24, 64>}, {pipeline_mode = #tpu.pipeline_mode<synchronous>, transform_indices = @transform_4, window_bounds = array<i64: 1, 64>}, {pipeline_mode = #tpu.pipeline_mode<synchronous>, transform_indices = @transform_5, window_bounds = array<i64: 64, 128>}, {pipeline_mode = #tpu.pipeline_mode<synchronous>, transform_indices = @transform_6, window_bounds = array<i64: 1, 128>}, {pipeline_mode = #tpu.pipeline_mode<synchronous>, transform_indices = @transform_7, window_bounds = array<i64: 128, 32>}, {pipeline_mode = #tpu.pipeline_mode<synchronous>, transform_indices = @transform_8, window_bounds = array<i64: 1, 32>}, {pipeline_mode = #tpu.pipeline_mode<synchronous>, transform_indices = @transform_9, window_bounds = array<i64: 32, 128>}, {pipeline_mode = #tpu.pipeline_mode<synchronous>, transform_indices = @transform_10, window_bounds = array<i64: 1, 128>}, {transform_indices = @transform_11, window_bounds = array<i64: 16, 128>}]} {
    %c0 = arith.constant 0 : index
    %c0_0 = arith.constant 0 : index
    %0 = vector.load %arg1[%c0, %c0_0] : memref<16x24xf32, #tpu.memory_space<vmem>>, vector<16x24xf32>
    %c0_1 = arith.constant 0 : index
    %c0_2 = arith.constant 0 : index
    %1 = vector.load %arg2[%c0_1, %c0_2] : memref<1x24xf32, #tpu.memory_space<vmem>>, vector<1x24xf32>
    %2 = vector.broadcast %1 : vector<1x24xf32> to vector<16x24xf32>
    %3 = arith.mulf %0, %2 : vector<16x24xf32>
    %c0_3 = arith.constant 0 : index
    %c0_4 = arith.constant 0 : index
    %4 = vector.load %arg3[%c0_3, %c0_4] : memref<1x24xf32, #tpu.memory_space<vmem>>, vector<1x24xf32>
    %5 = vector.broadcast %4 : vector<1x24xf32> to vector<16x24xf32>
    %6 = arith.addf %3, %5 : vector<16x24xf32>
    %cst = arith.constant 0.000000e+00 : f32
    %7 = vector.broadcast %cst : f32 to vector<16x24xf32>
    %8 = arith.maximumf %6, %7 : vector<16x24xf32>
    %9 = arith.truncf %8 : vector<16x24xf32> to vector<16x24xbf16>
    %c0_5 = arith.constant 0 : index
    %c0_6 = arith.constant 0 : index
    %10 = vector.load %arg4[%c0_5, %c0_6] : memref<24x64xbf16, #tpu.memory_space<vmem>>, vector<24x64xbf16>
    %cst_7 = arith.constant dense<0.000000e+00> : vector<16x64xf32>
    %11 = tpu.matmul %9, %10, %cst_7 {dimension_numbers = #tpu.dot_dimension_numbers<[1], [0], [0], [1], [0, 0, 1, 1], [], []>} : vector<16x24xbf16>, vector<24x64xbf16>, vector<16x64xf32> -> vector<16x64xf32>
    %c0_8 = arith.constant 0 : index
    %c0_9 = arith.constant 0 : index
    %12 = vector.load %arg5[%c0_8, %c0_9] : memref<1x64xf32, #tpu.memory_space<vmem>>, vector<1x64xf32>
    %13 = vector.broadcast %12 : vector<1x64xf32> to vector<16x64xf32>
    %14 = arith.addf %11, %13 : vector<16x64xf32>
    %cst_10 = arith.constant 0.000000e+00 : f32
    %15 = vector.broadcast %cst_10 : f32 to vector<16x64xf32>
    %16 = arith.maximumf %14, %15 : vector<16x64xf32>
    %17 = arith.truncf %16 : vector<16x64xf32> to vector<16x64xbf16>
    %c0_11 = arith.constant 0 : index
    %c0_12 = arith.constant 0 : index
    %18 = vector.load %arg6[%c0_11, %c0_12] : memref<64x128xbf16, #tpu.memory_space<vmem>>, vector<64x128xbf16>
    %cst_13 = arith.constant dense<0.000000e+00> : vector<16x128xf32>
    %19 = tpu.matmul %17, %18, %cst_13 {dimension_numbers = #tpu.dot_dimension_numbers<[1], [0], [0], [1], [0, 0, 1, 1], [], []>} : vector<16x64xbf16>, vector<64x128xbf16>, vector<16x128xf32> -> vector<16x128xf32>
    %c0_14 = arith.constant 0 : index
    %c0_15 = arith.constant 0 : index
    %20 = vector.load %arg7[%c0_14, %c0_15] : memref<1x128xf32, #tpu.memory_space<vmem>>, vector<1x128xf32>
    %21 = vector.broadcast %20 : vector<1x128xf32> to vector<16x128xf32>
    %22 = arith.addf %19, %21 : vector<16x128xf32>
    %cst_16 = arith.constant 0.000000e+00 : f32
    %23 = vector.broadcast %cst_16 : f32 to vector<16x128xf32>
    %24 = arith.maximumf %22, %23 : vector<16x128xf32>
    %25 = arith.truncf %24 : vector<16x128xf32> to vector<16x128xbf16>
    %c0_17 = arith.constant 0 : index
    %c0_18 = arith.constant 0 : index
    %26 = vector.load %arg8[%c0_17, %c0_18] : memref<128x32xbf16, #tpu.memory_space<vmem>>, vector<128x32xbf16>
    %cst_19 = arith.constant dense<0.000000e+00> : vector<16x32xf32>
    %27 = tpu.matmul %25, %26, %cst_19 {dimension_numbers = #tpu.dot_dimension_numbers<[1], [0], [0], [1], [0, 0, 1, 1], [], []>} : vector<16x128xbf16>, vector<128x32xbf16>, vector<16x32xf32> -> vector<16x32xf32>
    %c0_20 = arith.constant 0 : index
    %c0_21 = arith.constant 0 : index
    %28 = vector.load %arg9[%c0_20, %c0_21] : memref<1x32xf32, #tpu.memory_space<vmem>>, vector<1x32xf32>
    %29 = vector.broadcast %28 : vector<1x32xf32> to vector<16x32xf32>
    %30 = arith.addf %27, %29 : vector<16x32xf32>
    %cst_22 = arith.constant 0.000000e+00 : f32
    %31 = vector.broadcast %cst_22 : f32 to vector<16x32xf32>
    %32 = arith.maximumf %30, %31 : vector<16x32xf32>
    %33 = arith.truncf %32 : vector<16x32xf32> to vector<16x32xbf16>
    %c0_23 = arith.constant 0 : index
    %c0_24 = arith.constant 0 : index
    %34 = vector.load %arg10[%c0_23, %c0_24] : memref<32x128xbf16, #tpu.memory_space<vmem>>, vector<32x128xbf16>
    %cst_25 = arith.constant dense<0.000000e+00> : vector<16x128xf32>
    %35 = tpu.matmul %33, %34, %cst_25 {dimension_numbers = #tpu.dot_dimension_numbers<[1], [0], [0], [1], [0, 0, 1, 1], [], []>} : vector<16x32xbf16>, vector<32x128xbf16>, vector<16x128xf32> -> vector<16x128xf32>
    %c0_26 = arith.constant 0 : index
    %c0_27 = arith.constant 0 : index
    %36 = vector.load %arg11[%c0_26, %c0_27] : memref<1x128xf32, #tpu.memory_space<vmem>>, vector<1x128xf32>
    %37 = vector.broadcast %36 : vector<1x128xf32> to vector<16x128xf32>
    %38 = arith.addf %35, %37 : vector<16x128xf32>
    %39 = arith.truncf %38 : vector<16x128xf32> to vector<16x128xbf16>
    %c0_28 = arith.constant 0 : index
    %c0_29 = arith.constant 0 : index
    %40 = vector.load %arg12[%c0_28, %c0_29] : memref<16x128xbf16, #tpu.memory_space<vmem>>, vector<16x128xbf16>
    tpu.vector_store %arg12[%c0_28, %c0_29], %39 {strides = array<i32>} : memref<16x128xbf16, #tpu.memory_space<vmem>>, vector<16x128xbf16>,
    return
  }
  func.func @transform_0(%arg0: i32) -> (i32, i32) {
    %c0_i32 = arith.constant 0 : i32
    %c0_i32_0 = arith.constant 0 : i32
    return %arg0, %c0_i32 : i32, i32
  }
  func.func @transform_1(%arg0: i32) -> (i32, i32) {
    %c0_i32 = arith.constant 0 : i32
    %c0_i32_0 = arith.constant 0 : i32
    %c0_i32_1 = arith.constant 0 : i32
    return %c0_i32, %c0_i32_0 : i32, i32
  }
  func.func @transform_2(%arg0: i32) -> (i32, i32) {
    %c0_i32 = arith.constant 0 : i32
    %c0_i32_0 = arith.constant 0 : i32
    %c0_i32_1 = arith.constant 0 : i32
    return %c0_i32, %c0_i32_0 : i32, i32
  }
  func.func @transform_3(%arg0: i32) -> (i32, i32) {
    %c0_i32 = arith.constant 0 : i32
    %c0_i32_0 = arith.constant 0 : i32
    %c0_i32_1 = arith.constant 0 : i32
    return %c0_i32, %c0_i32_0 : i32, i32
  }
  func.func @transform_4(%arg0: i32) -> (i32, i32) {
    %c0_i32 = arith.constant 0 : i32
    %c0_i32_0 = arith.constant 0 : i32
    %c0_i32_1 = arith.constant 0 : i32
    return %c0_i32, %c0_i32_0 : i32, i32
  }
  func.func @transform_5(%arg0: i32) -> (i32, i32) {
    %c0_i32 = arith.constant 0 : i32
    %c0_i32_0 = arith.constant 0 : i32
    %c0_i32_1 = arith.constant 0 : i32
    return %c0_i32, %c0_i32_0 : i32, i32
  }
  func.func @transform_6(%arg0: i32) -> (i32, i32) {
    %c0_i32 = arith.constant 0 : i32
    %c0_i32_0 = arith.constant 0 : i32
    %c0_i32_1 = arith.constant 0 : i32
    return %c0_i32, %c0_i32_0 : i32, i32
  }
  func.func @transform_7(%arg0: i32) -> (i32, i32) {
    %c0_i32 = arith.constant 0 : i32
    %c0_i32_0 = arith.constant 0 : i32
    %c0_i32_1 = arith.constant 0 : i32
    return %c0_i32, %c0_i32_0 : i32, i32
  }
  func.func @transform_8(%arg0: i32) -> (i32, i32) {
    %c0_i32 = arith.constant 0 : i32
    %c0_i32_0 = arith.constant 0 : i32
    %c0_i32_1 = arith.constant 0 : i32
    return %c0_i32, %c0_i32_0 : i32, i32
  }
  func.func @transform_9(%arg0: i32) -> (i32, i32) {
    %c0_i32 = arith.constant 0 : i32
    %c0_i32_0 = arith.constant 0 : i32
    %c0_i32_1 = arith.constant 0 : i32
    return %c0_i32, %c0_i32_0 : i32, i32
  }
  func.func @transform_10(%arg0: i32) -> (i32, i32) {
    %c0_i32 = arith.constant 0 : i32
    %c0_i32_0 = arith.constant 0 : i32
    %c0_i32_1 = arith.constant 0 : i32
    return %c0_i32, %c0_i32_0 : i32, i32
  }
  func.func @transform_11(%arg0: i32) -> (i32, i32) {
    %c0_i32 = arith.constant 0 : i32
    %c0_i32_0 = arith.constant 0 : i32
    return %arg0, %c0_i32 : i32, i32
  }
}

</mosaic_0001>

<bundles_post_ra>
// kernel: tpu_custom_call.1
= control target key start
LH: loop header
LB: loop body
LE: loop exit
PB: predicated region body
PF: predicated region fallthrough
CT: control target
= control target key end

     0   :  { %v577_v1 = vmov 0.0   ;;  %vm86_vm0 = vcmask 1043456   ;;  %vm578_vm1 = vmmov 0   ;;  %vm82_vm2 = vcmask 195584   ;;  %s750_s0 = inlined_call_operand.vmem [shape: f32[16,24], index: 0, kind: input, shape index: {}]   ;;  %s751_s1 = inlined_call_operand.vmem [shape: f32[1,24], index: 1, kind: input, shape index: {}]   ;;  %s752_s2 = inlined_call_operand.vmem [shape: f32[1,24], index: 2, kind: input, shape index: {}]   ;;  %s753_s3 = inlined_call_operand.vmem [shape: bf16[24,64], index: 3, kind: input, shape index: {}]   ;;  %s754_s4 = inlined_call_operand.vmem [shape: f32[1,64], index: 4, kind: input, shape index: {}]   ;;  %s755_s5 = inlined_call_operand.vmem [shape: bf16[64,128], index: 5, kind: input, shape index: {}]   ;;  %s756_s6 = inlined_call_operand.vmem [shape: f32[1,128], index: 6, kind: input, shape index: {}]   ;;  %s757_s7 = inlined_call_operand.vmem [shape: bf16[128,32], index: 7, kind: input, shape index: {}]   ;;  %s758_s8 = inlined_call_operand.vmem [shape: f32[1,32], index: 8, kind: input, shape index: {}]   ;;  %s759_s9 = inlined_call_operand.vmem [shape: bf16[32,128], index: 9, kind: input, shape index: {}]   ;;  %s760_s10 = inlined_call_operand.vmem [shape: f32[1,128], index: 10, kind: input, shape index: {}]   ;;  %s761_s11 = inlined_call_operand.hbm [shape: bf16[16,128], index: 11, kind: output, shape index: {}]  }
   0x1   :  { %v537_v0 = vld [vmem:[%s753_s3] sm:$0xff]   ;;  %484 = vmatprep.subr.bf16.mxu1 %v577_v1  ;;  %v538_v2 = vld [vmem:[%s753_s3 + $0x8] ss:$0 sps:$4 sm:$0xff]   ;;  %504 = vmatprep.subr.bf16.mxu0 %v577_v1 }
   0x2   :  { %485 = vmatpush3.bf16.msra.mxu1 %v537_v0  ;;  %488 = vmatprep.mubr.msk.bf16.mxu1 %vm578_vm1, %v577_v1  ;;  %v40_v3 = vld [vmem:[%s750_s0] sm:$0xff]  ;;  %v41_v4 = vld [vmem:[%s750_s0 + $0x8] sm:$0xff]  ;;  %v88_v6 = vsel %vm86_vm0, %v538_v2, 0 }
   0x3   :  { %v430_v5 = vld [vmem:[%s751_s1] ss:$0 sm:$0xff]  ;;  %486 = vmatprep.subr.bf16.mxu1 %v577_v1  ;;  %520 = vmatprep.mubr.msk.bf16.mxu0 %vm578_vm1, %v577_v1  ;;  %v540_v16 = vld [vmem:[%s755_s5 + $0x8] sm:$0xff]  }
   0x4   :  { %v49_v7 = vmul.f32 %v430_v5, %v40_v3  ;;  %v50_v8 = vmul.f32 %v430_v5, %v41_v4  ;;  %v431_v9 = vld [vmem:[%s752_s2] ss:$0 sm:$0xff] }
   0x5   :  { %v539_v12 = vld [vmem:[%s755_s5] sm:$0xff]  }
   0x6   :  { %v58_v10 = vadd.f32 %v431_v9, %v49_v7  ;;  %v59_v11 = vadd.f32 %v431_v9, %v50_v8  ;;  %487 = vmatpush3.bf16.msra.mxu1 %v88_v6 }
   0x7   :  { %492 = vmatprep.subr.bf16.mxu1 %v577_v1 }
   0x8   :  { %v60_v13 = vmax.f32 %v58_v10, 0.0  ;;  %v61_v14 = vmax.f32 %v59_v11, 0.0 }
   0xa   :  { %v62_v15 = vpack.c.bf16 %v61_v14, %v60_v13 }
   0xc   :  { %489 = vmatmul.mubr.msk.bf16.vlgmr.msra.gmra.mrb[0].mxu1 %vm82_vm2, %v62_v15 }
   0xd   :  { %493 = vmatpush3.bf16.msra.mxu1 %v539_v12  ;;  %500 = vmatprep.mubr.msk.bf16.mxu1 %vm578_vm1, %v577_v1 }
   0xe   :  { %494 = vmatprep.subr.bf16.mxu1 %v577_v1 }
   0xf   :  { %16 = vsyncpa [#allocation3], 0  ;;  %v541_v17 = vld [vmem:[%s755_s5 + $0x10] sm:$0xff]   ;;  %v542_v18 = vld [vmem:[%s755_s5 + $0x18] sm:$0xff]   ;;  %vm173_vm3 = vcmask 523264   ;;  %vm359_vm4 = vcmask 261120  }
  0x10   :  { %v543_v19 = vld [vmem:[%s757_s7] sm:$0xff]   ;;  %v544_v20 = vld [vmem:[%s757_s7 + $0x8] sm:$0xff]   ;;  %v545_v21 = vld [vmem:[%s757_s7 + $0x10] sm:$0xff]  }
  0x11   :  { %495 = vmatpush3.bf16.msra.mxu1 %v540_v16  ;;  %505 = vmatpush3.bf16.msra.mxu0 %v543_v19  ;;  %v546_v22 = vld [vmem:[%s757_s7 + $0x18] sm:$0xff]   ;;  %v547_v23 = vld [vmem:[%s757_s7 + $0x20] sm:$0xff]   ;;  %v548_v24 = vld [vmem:[%s757_s7 + $0x28] sm:$0xff]  }
  0x12   :  { %496 = vmatprep.subr.bf16.mxu1 %v577_v1  ;;  %506 = vmatprep.subr.bf16.mxu0 %v577_v1  ;;  %v432_v25 = vld [vmem:[%s754_s4] ss:$0 sm:$0xff]  ;;  %v549_v35 = vld [vmem:[%s757_s7 + $0x30] sm:$0xff]   ;;  %v550_v36 = vld [vmem:[%s757_s7 + $0x38] sm:$0xff]  }
  0x13   :  { %v436_v37 = vld [vmem:[%s756_s6] ss:$0 sm:$0xff]  ;;  %v552_v48 = vld [vmem:[%s759_s9 + $0x8] sm:$0xff]  }
  0x14   :  { %v551_v47 = vld [vmem:[%s759_s9] sm:$0xff]   ;;  %s579_s9 = smov [#allocation2]  }
  0x15   :  { %497 = vmatpush3.bf16.msra.mxu1 %v541_v17  ;;  %507 = vmatpush3.bf16.msra.mxu0 %v544_v20  ;;  %v442_v49 = vld [vmem:[%s758_s8] ss:$0 sm:$0xff]  ;;  %s419_s15 = sshll.u32 %s579_s9, 4  ;;  %s420_s15 = int_to_ptr.vmem [resolvable:$true] %s419_s15 }
  0x16   :  { %498 = vmatprep.subr.bf16.mxu1 %v577_v1  ;;  %508 = vmatprep.subr.bf16.mxu0 %v577_v1  ;;  %v451_v59 = vld [vmem:[%s760_s10] ss:$0 sm:$0xff]  ;;  %s553_s8 = scalar_lea.vmem %s420_s15, 128  ;;  %p558_p1 = scmp.lt.s32.totalorder %s420_s15, %s420_s15 }
  0x17   :  { %p554_p0 = scmp.ne.s32.totalorder %s420_s15, %s553_s8  ;;  %p559_p2 = scmp.lt.s32.totalorder %s553_s8, %s553_s8 }
  0x19   :  { %499 = vmatpush3.bf16.msra.mxu1 %v542_v18  ;;  %509 = vmatpush3.bf16.msra.mxu0 %v545_v21  ;;  %p560_p3 = por %p559_p2, %p558_p1 }
  0x1a   :  { %524 = vmatprep.subr.bf16.mxu1 %v577_v1  ;;  %510 = vmatprep.subr.bf16.mxu0 %v577_v1 }
  0x1b   :  { %p561_p4 = pnand %p560_p3, %p554_p0 }
  0x1d   :  { %511 = vmatpush3.bf16.msra.mxu0 %v546_v22 }
  0x1e   :  { %512 = vmatprep.subr.bf16.mxu0 %v577_v1 }
  0x21   :  { %513 = vmatpush3.bf16.msra.mxu0 %v547_v23 }
  0x22   :  { %514 = vmatprep.subr.bf16.mxu0 %v577_v1 }
  0x25   :  { %515 = vmatpush3.bf16.msra.mxu0 %v548_v24 }
  0x26   :  { %516 = vmatprep.subr.bf16.mxu0 %v577_v1 }
  0x29   :  { %517 = vmatpush3.bf16.msra.mxu0 %v549_v35 }
  0x2a   :  { %518 = vmatprep.subr.bf16.mxu0 %v577_v1 }
  0x2d   :  { %519 = vmatpush3.bf16.msra.mxu0 %v550_v36 }
  0xdf   :  { %v124_v26 = vpop.f32.mrb[0].mxu1 }
  0xe0   :  { %v125_v27 = vadd.f32 %v432_v25, %v124_v26  ;;  %v490_v28 = vpop.f32.mrb[1].mxu1 }
  0xe1   :  { %v127_v29 = vpop.f32.mrb[2].mxu1 }
  0xe2   :  { %v128_v30 = vadd.f32 %v432_v25, %v127_v29  ;;  %v491_v31 = vpop.f32.mrb[3].mxu1  ;;  %v131_v32 = vmax.f32 %v125_v27, 0.0 }
  0xe4   :  { %v132_v33 = vmax.f32 %v128_v30, 0.0 }
  0xe6   :  { %v133_v34 = vpack.c.bf16 %v132_v33, %v131_v32 }
  0xe8   :  { %501 = vmatmul.mubr.msk.bf16.vlgmr.msra.gmra.mrb[4].mxu1 %vm173_vm3, %v133_v34 }
  0xe9   :  { %528 = vmatprep.mubr.msk.bf16.mxu1 %vm578_vm1, %v577_v1  ;;  %525 = vmatpush3.bf16.msra.mxu1 %v551_v47 }
  0xea   :  { %526 = vmatprep.subr.bf16.mxu1 %v577_v1 }
  0xed   :  { %527 = vmatpush3.bf16.msra.mxu1 %v552_v48 }
 0x1bb   :  { %v211_v38 = vpop.f32.mrb[4].mxu1 }
 0x1bc   :  { %v212_v39 = vadd.f32 %v436_v37, %v211_v38  ;;  %v502_v40 = vpop.f32.mrb[5].mxu1 }
 0x1bd   :  { %v214_v41 = vpop.f32.mrb[6].mxu1 }
 0x1be   :  { %v215_v42 = vadd.f32 %v436_v37, %v214_v41  ;;  %v503_v43 = vpop.f32.mrb[7].mxu1  ;;  %v218_v44 = vmax.f32 %v212_v39, 0.0 }
 0x1c0   :  { %v219_v45 = vmax.f32 %v215_v42, 0.0 }
 0x1c2   :  { %v220_v46 = vpack.c.bf16 %v219_v45, %v218_v44 }
 0x1c4   :  { %521 = vmatmul.mubr.bf16.vlgmr.msra.gmra.mrb[0].mxu0 %v220_v46 }
 0x297   :  { %v326_v50 = vpop.f32.mrb[0].mxu0 }
 0x298   :  { %v327_v51 = vadd.f32 %v442_v49, %v326_v50  ;;  %v522_v52 = vpop.f32.mrb[1].mxu0 }
 0x299   :  { %v329_v53 = vpop.f32.mrb[2].mxu0 }
 0x29a   :  { %v330_v54 = vadd.f32 %v442_v49, %v329_v53  ;;  %v523_v55 = vpop.f32.mrb[3].mxu0  ;;  %v333_v56 = vmax.f32 %v327_v51, 0.0 }
 0x29c   :  { %v334_v57 = vmax.f32 %v330_v54, 0.0 }
 0x29e   :  { %v335_v58 = vpack.c.bf16 %v334_v57, %v333_v56 }
 0x2a0   :  { %529 = vmatmul.mubr.msk.bf16.vlgmr.msra.gmra.mrb[8].mxu1 %vm359_vm4, %v335_v58 }
 0x373   :  { %v397_v60 = vpop.f32.mrb[8].mxu1 }
 0x374   :  { %v530_v61 = vpop.f32.mrb[9].mxu1  ;;  %v398_v63 = vadd.f32 %v451_v59, %v397_v60 }
 0x375   :  { %v400_v62 = vpop.f32.mrb[10].mxu1 }
 0x376   :  { %v401_v0 = vadd.f32 %v451_v59, %v400_v62  ;;  %v531_v1 = vpop.f32.mrb[11].mxu1 }
 0x378   :  { %v462_v2 = vpack.c.bf16 %v401_v0, %v398_v63 }
 0x37a   :  { %463 = vst [vmem:[#allocation2] sm:$0xff] %v462_v2  }
 0x37b   :  { %564 = shalt.err (!%p561_p4)
}
 0x37c   :  { %s565_s17 = scalar_lea.hbm %s761_s11, 128 }
 0x37d   :  { %p566_p5 = scmp.ne.s32.totalorder %s761_s11, %s565_s17  ;;  %p569_p6 = scmp.lt.u32.totalorder %s565_s17, %s761_s11 }
 0x37f   :  { %p571_p7 = pnand %p569_p6, %p566_p5 }
 0x381   :  { %574 = shalt.err (!%p571_p7)
}
 0x382   :  { %s580_s21 = smov 64   ;;  %s581_s22 = smov 4  }
 0x383   :  { %425 = dma.vmem_to_hbm [thread:$0]  %s420_s15, 128, %s761_s11, [#allocation3], %s580_s21, %s580_s21, %s581_s22  }
 0x384   :  { %575 = dma.done.wait [#allocation3], 128  }
 0x385   :  { %576 = vsyncadd [#allocation3], 4294967168 }
 0x386   :  { %429 = vsyncpa [#allocation3], 1 }

</bundles_post_ra>
